<compile_context>
chip_gen: v7x
topology: tpu7x:2x2x1
jax: 0.10.0
libtpu: 0.0.40
codegen_flags: <defaults>
</compile_context>

<pallas_src>
import functools

import jax
import jax.numpy as jnp
from jax import lax
from jax.experimental import pallas as pl
from jax.experimental.pallas import tpu as pltpu


def mha_kernel(x_ref, wqkv_ref, wproj_ref, o_ref, ycat_ref, *, heads_nb, d_k,
               masked):
    T, D = x_ref.shape
    hdk = heads_nb * d_k

    x_bf = x_ref[...].astype(jnp.bfloat16)                 # (T, D) bf16

    # --- fused QKV projection: one MXU matmul for all heads ------------------
    # (1/sqrt(d_k) already folded into the Q columns of wqkv at prep time)
    qkv = jnp.dot(x_bf, wqkv_ref[...],
                  preferred_element_type=jnp.float32)      # (T, 3*hdk) f32
    qkv_bf = qkv.astype(jnp.bfloat16)                      # single slab cast

    if masked:
        row = lax.broadcasted_iota(jnp.int32, (T, T), 0)
        col = lax.broadcasted_iota(jnp.int32, (T, T), 1)
        keep = col <= row         # causal: diagonal always kept -> finite rows

    # --- per-head score math (heads_nb small & static; outputs go to scratch)
    for h in range(heads_nb):
        lo = h * d_k
        q = qkv_bf[:, lo:lo + d_k]                         # (T, d_k) bf16
        k = qkv_bf[:, hdk + lo:hdk + lo + d_k]
        v = qkv_bf[:, 2 * hdk + lo:2 * hdk + lo + d_k]

        # q @ k^T without materializing a transpose
        s = lax.dot_general(q, k, (((1,), (1,)), ((), ())),
                            preferred_element_type=jnp.float32)   # (T, T) f32
        if masked:
            s = jnp.where(keep, s, -jnp.inf)               # mask(): -inf above diag
        s = s - jnp.max(s, axis=-1, keepdims=True)
        p = jnp.exp(s)
        denom = jnp.sum(p, axis=-1, keepdims=True)
        p = p * pl.reciprocal(denom, approx=True)          # softmax, EUP divide

        y = jnp.dot(p.astype(jnp.bfloat16), v,
                    preferred_element_type=jnp.float32)    # (T, d_k) f32
        ycat_ref[:, lo:lo + d_k] = y.astype(jnp.bfloat16)  # concat via scratch

    # --- single output projection matmul --------------------------------------
    out = jnp.dot(ycat_ref[...], wproj_ref[...],
                  preferred_element_type=jnp.float32)      # (T, D) f32
    o_ref[...] = out.astype(o_ref.dtype)


def _pick_vmem_limit():
    """~96 MiB on 128-MiB chips (v5e/v6e), 32 MiB on 64-MiB chips (v7x)."""
    try:
        cap = pltpu.get_tpu_info().vmem_capacity_bytes
    except Exception:
        cap = 64 * 1024 * 1024
    limit = min(cap - 32 * 1024 * 1024, 96 * 1024 * 1024)
    return max(limit, 32 * 1024 * 1024)


def prepare_weights(params):
    """One-time weight fusion (hoisted out of the per-call forward path)."""
    wq, wk, wv, wproj = params["wq"], params["wk"], params["wv"], params["wproj"]
    heads_nb, D, d_k = wq.shape
    hdk = heads_nb * d_k
    scale = float(d_k) ** -0.5

    def flat(w):                                  # (H, D, d_k) -> (D, H*d_k)
        return jnp.transpose(w, (1, 0, 2)).reshape(D, hdk)

    # fold softmax scale into the Q column block
    wqkv = jnp.concatenate([flat(wq) * scale, flat(wk), flat(wv)],
                           axis=-1).astype(jnp.bfloat16)   # (D, 3*hdk)
    wproj_bf = wproj.astype(jnp.bfloat16)                  # (hdk, D)
    return wqkv, wproj_bf


def mha_forward(x, wqkv, wproj_bf, heads_nb, d_k, masked=True):
    B, T, D = x.shape
    hdk = heads_nb * d_k

    kernel = functools.partial(mha_kernel, heads_nb=heads_nb, d_k=d_k,
                               masked=masked)
    return pl.pallas_call(
        kernel,
        out_shape=jax.ShapeDtypeStruct((B, T, D), x.dtype),
        grid=(B,),
        in_specs=[
            pl.BlockSpec((pl.Squeezed(), T, D), lambda b: (b, 0, 0)),  # x slab
            pl.BlockSpec((D, 3 * hdk), lambda b: (0, 0)),       # fused QKV weights
            pl.BlockSpec((hdk, D), lambda b: (0, 0)),            # W_proj
        ],
        out_specs=pl.BlockSpec((pl.Squeezed(), T, D), lambda b: (b, 0, 0)),
        scratch_shapes=[pltpu.VMEM((T, hdk), jnp.bfloat16)],      # concat slab
        compiler_params=pltpu.CompilerParams(
            dimension_semantics=("parallel",),                    # megacore
            vmem_limit_bytes=_pick_vmem_limit(),
        ),
    )(x, wqkv, wproj_bf)


def init_params(key, heads_nb, d_k, d_embedding):
    """Deterministic synthetic parameters (PyTorch-Linear-style uniform init)."""
    D = d_embedding
    ks = jax.random.split(key, 4)

    def u(k, shape, fan_in):
        bound = 1.0 / (fan_in ** 0.5)
        return jax.random.uniform(k, shape, jnp.float32, -bound, bound)

    return dict(
        # per-head projection weights, stored pre-transposed for x @ W
        wq=u(ks[0], (heads_nb, D, d_k), D),
        wk=u(ks[1], (heads_nb, D, d_k), D),
        wv=u(ks[2], (heads_nb, D, d_k), D),
        # W_proj stored as (H*d_k, D) so concat(heads) @ wproj
        wproj=u(ks[3], (heads_nb * d_k, D), heads_nb * d_k),
    )


def mha_reference(x, params, masked=True):
    """Pure-JAX (f32) reference mirroring the PyTorch forward exactly."""
    wq, wk, wv, wproj = params["wq"], params["wk"], params["wv"], params["wproj"]
    heads_nb, D, d_k = wq.shape
    B, T, _ = x.shape

    q = jnp.einsum("btd,hdk->bhtk", x, wq)
    k = jnp.einsum("btd,hdk->bhtk", x, wk)
    v = jnp.einsum("btd,hdk->bhtk", x, wv)
    s = jnp.einsum("bhtk,bhsk->bhts", q, k) * d_k ** -0.5
    if masked:
        causal = jnp.tril(jnp.ones((T, T), bool))
        s = jnp.where(causal, s, -jnp.inf)
    p = jax.nn.softmax(s, axis=-1)
    y = jnp.einsum("bhts,bhsk->bhtk", p, v)
    y_cat = jnp.transpose(y, (0, 2, 1, 3)).reshape(B, T, heads_nb * d_k)
    return y_cat @ wproj


if __name__ == "__main__":
    heads_nb, d_k, d_embedding = 4, 8, 32
    B, T = 2, 8
    masked = True

    key = jax.random.PRNGKey(0)
    kx, kp = jax.random.split(key)
    x = jax.random.normal(kx, (B, T, d_embedding), jnp.float32)
    params = init_params(kp, heads_nb, d_k, d_embedding)

    # one-time weight fusion (scale folded into Q block), outside forward path
    wqkv, wproj_bf = prepare_weights(params)

    out = jax.block_until_ready(
        mha_forward(x, wqkv, wproj_bf, heads_nb, d_k, masked=masked))
    ref = mha_reference(x, params, masked=masked)

    assert out.shape == (B, T, d_embedding)
    assert bool(jnp.all(jnp.isfinite(out)))
    max_err = float(jnp.max(jnp.abs(out - ref)))
    # bf16 MXU operands + approx reciprocal vs f32 reference
    assert max_err < 2e-2, f"mismatch vs reference, max abs err = {max_err}"
    print("KERNEL_OK")
</pallas_src>

<mosaic_0001>
module attributes {stable_mosaic.version = 11 : i64} {
  func.func @mha_kernel(%arg0: i32, %arg1: memref<1x8x32xf32, #tpu.memory_space<vmem>>, %arg2: memref<32x96xbf16, #tpu.memory_space<vmem>>, %arg3: memref<32x32xbf16, #tpu.memory_space<vmem>>, %arg4: memref<1x8x32xf32, #tpu.memory_space<vmem>>, %arg5: memref<8x32xbf16, #tpu.memory_space<vmem>>) attributes {dimension_semantics = [#tpu.dimension_semantics<parallel>], iteration_bounds = array<i64: 2>, scalar_prefetch = 0 : i64, scratch_operands = 1 : i64, tpu.core_type = #tpu.core_type<tc>, window_params = [{transform_indices = @transform_0, window_bounds = array<i64: 1, 8, 32>}, {pipeline_mode = #tpu.pipeline_mode<synchronous>, transform_indices = @transform_1, window_bounds = array<i64: 32, 96>}, {pipeline_mode = #tpu.pipeline_mode<synchronous>, transform_indices = @transform_2, window_bounds = array<i64: 32, 32>}, {transform_indices = @transform_3, window_bounds = array<i64: 1, 8, 32>}]} {
    %c0 = arith.constant 0 : index
    %c0_0 = arith.constant 0 : index
    %c0_1 = arith.constant 0 : index
    %0 = vector.load %arg1[%c0, %c0_0, %c0_1] : memref<1x8x32xf32, #tpu.memory_space<vmem>>, vector<1x8x32xf32>
    %1 = vector.shape_cast %0 : vector<1x8x32xf32> to vector<8x32xf32>
    %2 = arith.truncf %1 : vector<8x32xf32> to vector<8x32xbf16>
    %c0_2 = arith.constant 0 : index
    %c0_3 = arith.constant 0 : index
    %3 = vector.load %arg2[%c0_2, %c0_3] : memref<32x96xbf16, #tpu.memory_space<vmem>>, vector<32x96xbf16>
    %cst = arith.constant dense<0.000000e+00> : vector<8x96xf32>
    %4 = tpu.matmul %2, %3, %cst {dimension_numbers = #tpu.dot_dimension_numbers<[1], [0], [0], [1], [0, 0, 1, 1], [], []>} : vector<8x32xbf16>, vector<32x96xbf16>, vector<8x96xf32> -> vector<8x96xf32>
    %5 = arith.truncf %4 : vector<8x96xf32> to vector<8x96xbf16>
    %6 = tpu.iota {dimensions = array<i32: 0>} : vector<8x8xi32>
    %7 = tpu.iota {dimensions = array<i32: 1>} : vector<8x8xi32>
    %8 = arith.cmpi sle, %7, %6 : vector<8x8xi32>
    %9 = vector.extract_strided_slice %5 {offsets = [0, 0], sizes = [8, 8], strides = [1, 1]} : vector<8x96xbf16> to vector<8x8xbf16>
    %10 = vector.extract_strided_slice %5 {offsets = [0, 32], sizes = [8, 8], strides = [1, 1]} : vector<8x96xbf16> to vector<8x8xbf16>
    %11 = vector.extract_strided_slice %5 {offsets = [0, 64], sizes = [8, 8], strides = [1, 1]} : vector<8x96xbf16> to vector<8x8xbf16>
    %cst_4 = arith.constant dense<0.000000e+00> : vector<8x8xf32>
    %12 = tpu.matmul %9, %10, %cst_4 {dimension_numbers = #tpu.dot_dimension_numbers<[1], [1], [0], [0], [0, 0, 1, 0], [], []>} : vector<8x8xbf16>, vector<8x8xbf16>, vector<8x8xf32> -> vector<8x8xf32>
    %cst_5 = arith.constant 0xFF800000 : f32
    %13 = vector.broadcast %cst_5 : f32 to vector<8x8xf32>
    %14 = arith.select %8, %12, %13 : vector<8x8xi1>, vector<8x8xf32>
    %cst_6 = arith.constant dense<0xFF800000> : vector<8xf32>
    %15 = vector.multi_reduction <maximumf>, %14, %cst_6 [1] : vector<8x8xf32> to vector<8xf32>
    %16 = vector.shape_cast %15 : vector<8xf32> to vector<8x1xf32>
    %17 = vector.broadcast %16 : vector<8x1xf32> to vector<8x8xf32>
    %18 = arith.subf %14, %17 : vector<8x8xf32>
    %19 = math.exp %18 : vector<8x8xf32>
    %cst_7 = arith.constant dense<0.000000e+00> : vector<8xf32>
    %20 = vector.multi_reduction <add>, %19, %cst_7 [1] : vector<8x8xf32> to vector<8xf32>
    %21 = vector.shape_cast %20 : vector<8xf32> to vector<8x1xf32>
    %22 = tpu.reciprocal %21 {approx = true} : vector<8x1xf32> -> vector<8x1xf32>
    %23 = vector.broadcast %22 : vector<8x1xf32> to vector<8x8xf32>
    %24 = arith.mulf %19, %23 : vector<8x8xf32>
    %25 = arith.truncf %24 : vector<8x8xf32> to vector<8x8xbf16>
    %cst_8 = arith.constant dense<0.000000e+00> : vector<8x8xf32>
    %26 = tpu.matmul %25, %11, %cst_8 {dimension_numbers = #tpu.dot_dimension_numbers<[1], [0], [0], [1], [0, 0, 1, 1], [], []>} : vector<8x8xbf16>, vector<8x8xbf16>, vector<8x8xf32> -> vector<8x8xf32>
    %27 = arith.truncf %26 : vector<8x8xf32> to vector<8x8xbf16>
    %c0_9 = arith.constant 0 : index
    %c0_10 = arith.constant 0 : index
    %28 = vector.load %arg5[%c0_9, %c0_10] : memref<8x32xbf16, #tpu.memory_space<vmem>>, vector<8x8xbf16>
    tpu.vector_store %arg5[%c0_9, %c0_10], %27 {strides = array<i32>} : memref<8x32xbf16, #tpu.memory_space<vmem>>, vector<8x8xbf16>,
    %29 = vector.extract_strided_slice %5 {offsets = [0, 8], sizes = [8, 8], strides = [1, 1]} : vector<8x96xbf16> to vector<8x8xbf16>
    %30 = vector.extract_strided_slice %5 {offsets = [0, 40], sizes = [8, 8], strides = [1, 1]} : vector<8x96xbf16> to vector<8x8xbf16>
    %31 = vector.extract_strided_slice %5 {offsets = [0, 72], sizes = [8, 8], strides = [1, 1]} : vector<8x96xbf16> to vector<8x8xbf16>
    %cst_11 = arith.constant dense<0.000000e+00> : vector<8x8xf32>
    %32 = tpu.matmul %29, %30, %cst_11 {dimension_numbers = #tpu.dot_dimension_numbers<[1], [1], [0], [0], [0, 0, 1, 0], [], []>} : vector<8x8xbf16>, vector<8x8xbf16>, vector<8x8xf32> -> vector<8x8xf32>
    %cst_12 = arith.constant 0xFF800000 : f32
    %33 = vector.broadcast %cst_12 : f32 to vector<8x8xf32>
    %34 = arith.select %8, %32, %33 : vector<8x8xi1>, vector<8x8xf32>
    %cst_13 = arith.constant dense<0xFF800000> : vector<8xf32>
    %35 = vector.multi_reduction <maximumf>, %34, %cst_13 [1] : vector<8x8xf32> to vector<8xf32>
    %36 = vector.shape_cast %35 : vector<8xf32> to vector<8x1xf32>
    %37 = vector.broadcast %36 : vector<8x1xf32> to vector<8x8xf32>
    %38 = arith.subf %34, %37 : vector<8x8xf32>
    %39 = math.exp %38 : vector<8x8xf32>
    %cst_14 = arith.constant dense<0.000000e+00> : vector<8xf32>
    %40 = vector.multi_reduction <add>, %39, %cst_14 [1] : vector<8x8xf32> to vector<8xf32>
    %41 = vector.shape_cast %40 : vector<8xf32> to vector<8x1xf32>
    %42 = tpu.reciprocal %41 {approx = true} : vector<8x1xf32> -> vector<8x1xf32>
    %43 = vector.broadcast %42 : vector<8x1xf32> to vector<8x8xf32>
    %44 = arith.mulf %39, %43 : vector<8x8xf32>
    %45 = arith.truncf %44 : vector<8x8xf32> to vector<8x8xbf16>
    %cst_15 = arith.constant dense<0.000000e+00> : vector<8x8xf32>
    %46 = tpu.matmul %45, %31, %cst_15 {dimension_numbers = #tpu.dot_dimension_numbers<[1], [0], [0], [1], [0, 0, 1, 1], [], []>} : vector<8x8xbf16>, vector<8x8xbf16>, vector<8x8xf32> -> vector<8x8xf32>
    %47 = arith.truncf %46 : vector<8x8xf32> to vector<8x8xbf16>
    %c0_16 = arith.constant 0 : index
    %c8 = arith.constant 8 : index
    %48 = vector.load %arg5[%c0_16, %c8] : memref<8x32xbf16, #tpu.memory_space<vmem>>, vector<8x8xbf16>
    tpu.vector_store %arg5[%c0_16, %c8], %47 {strides = array<i32>} : memref<8x32xbf16, #tpu.memory_space<vmem>>, vector<8x8xbf16>,
    %49 = vector.extract_strided_slice %5 {offsets = [0, 16], sizes = [8, 8], strides = [1, 1]} : vector<8x96xbf16> to vector<8x8xbf16>
    %50 = vector.extract_strided_slice %5 {offsets = [0, 48], sizes = [8, 8], strides = [1, 1]} : vector<8x96xbf16> to vector<8x8xbf16>
    %51 = vector.extract_strided_slice %5 {offsets = [0, 80], sizes = [8, 8], strides = [1, 1]} : vector<8x96xbf16> to vector<8x8xbf16>
    %cst_17 = arith.constant dense<0.000000e+00> : vector<8x8xf32>
    %52 = tpu.matmul %49, %50, %cst_17 {dimension_numbers = #tpu.dot_dimension_numbers<[1], [1], [0], [0], [0, 0, 1, 0], [], []>} : vector<8x8xbf16>, vector<8x8xbf16>, vector<8x8xf32> -> vector<8x8xf32>
    %cst_18 = arith.constant 0xFF800000 : f32
    %53 = vector.broadcast %cst_18 : f32 to vector<8x8xf32>
    %54 = arith.select %8, %52, %53 : vector<8x8xi1>, vector<8x8xf32>
    %cst_19 = arith.constant dense<0xFF800000> : vector<8xf32>
    %55 = vector.multi_reduction <maximumf>, %54, %cst_19 [1] : vector<8x8xf32> to vector<8xf32>
    %56 = vector.shape_cast %55 : vector<8xf32> to vector<8x1xf32>
    %57 = vector.broadcast %56 : vector<8x1xf32> to vector<8x8xf32>
    %58 = arith.subf %54, %57 : vector<8x8xf32>
    %59 = math.exp %58 : vector<8x8xf32>
    %cst_20 = arith.constant dense<0.000000e+00> : vector<8xf32>
    %60 = vector.multi_reduction <add>, %59, %cst_20 [1] : vector<8x8xf32> to vector<8xf32>
    %61 = vector.shape_cast %60 : vector<8xf32> to vector<8x1xf32>
    %62 = tpu.reciprocal %61 {approx = true} : vector<8x1xf32> -> vector<8x1xf32>
    %63 = vector.broadcast %62 : vector<8x1xf32> to vector<8x8xf32>
    %64 = arith.mulf %59, %63 : vector<8x8xf32>
    %65 = arith.truncf %64 : vector<8x8xf32> to vector<8x8xbf16>
    %cst_21 = arith.constant dense<0.000000e+00> : vector<8x8xf32>
    %66 = tpu.matmul %65, %51, %cst_21 {dimension_numbers = #tpu.dot_dimension_numbers<[1], [0], [0], [1], [0, 0, 1, 1], [], []>} : vector<8x8xbf16>, vector<8x8xbf16>, vector<8x8xf32> -> vector<8x8xf32>
    %67 = arith.truncf %66 : vector<8x8xf32> to vector<8x8xbf16>
    %c0_22 = arith.constant 0 : index
    %c16 = arith.constant 16 : index
    %68 = vector.load %arg5[%c0_22, %c16] : memref<8x32xbf16, #tpu.memory_space<vmem>>, vector<8x8xbf16>
    tpu.vector_store %arg5[%c0_22, %c16], %67 {strides = array<i32>} : memref<8x32xbf16, #tpu.memory_space<vmem>>, vector<8x8xbf16>,
    %69 = vector.extract_strided_slice %5 {offsets = [0, 24], sizes = [8, 8], strides = [1, 1]} : vector<8x96xbf16> to vector<8x8xbf16>
    %70 = vector.extract_strided_slice %5 {offsets = [0, 56], sizes = [8, 8], strides = [1, 1]} : vector<8x96xbf16> to vector<8x8xbf16>
    %71 = vector.extract_strided_slice %5 {offsets = [0, 88], sizes = [8, 8], strides = [1, 1]} : vector<8x96xbf16> to vector<8x8xbf16>
    %cst_23 = arith.constant dense<0.000000e+00> : vector<8x8xf32>
    %72 = tpu.matmul %69, %70, %cst_23 {dimension_numbers = #tpu.dot_dimension_numbers<[1], [1], [0], [0], [0, 0, 1, 0], [], []>} : vector<8x8xbf16>, vector<8x8xbf16>, vector<8x8xf32> -> vector<8x8xf32>
    %cst_24 = arith.constant 0xFF800000 : f32
    %73 = vector.broadcast %cst_24 : f32 to vector<8x8xf32>
    %74 = arith.select %8, %72, %73 : vector<8x8xi1>, vector<8x8xf32>
    %cst_25 = arith.constant dense<0xFF800000> : vector<8xf32>
    %75 = vector.multi_reduction <maximumf>, %74, %cst_25 [1] : vector<8x8xf32> to vector<8xf32>
    %76 = vector.shape_cast %75 : vector<8xf32> to vector<8x1xf32>
    %77 = vector.broadcast %76 : vector<8x1xf32> to vector<8x8xf32>
    %78 = arith.subf %74, %77 : vector<8x8xf32>
    %79 = math.exp %78 : vector<8x8xf32>
    %cst_26 = arith.constant dense<0.000000e+00> : vector<8xf32>
    %80 = vector.multi_reduction <add>, %79, %cst_26 [1] : vector<8x8xf32> to vector<8xf32>
    %81 = vector.shape_cast %80 : vector<8xf32> to vector<8x1xf32>
    %82 = tpu.reciprocal %81 {approx = true} : vector<8x1xf32> -> vector<8x1xf32>
    %83 = vector.broadcast %82 : vector<8x1xf32> to vector<8x8xf32>
    %84 = arith.mulf %79, %83 : vector<8x8xf32>
    %85 = arith.truncf %84 : vector<8x8xf32> to vector<8x8xbf16>
    %cst_27 = arith.constant dense<0.000000e+00> : vector<8x8xf32>
    %86 = tpu.matmul %85, %71, %cst_27 {dimension_numbers = #tpu.dot_dimension_numbers<[1], [0], [0], [1], [0, 0, 1, 1], [], []>} : vector<8x8xbf16>, vector<8x8xbf16>, vector<8x8xf32> -> vector<8x8xf32>
    %87 = arith.truncf %86 : vector<8x8xf32> to vector<8x8xbf16>
    %c0_28 = arith.constant 0 : index
    %c24 = arith.constant 24 : index
    %88 = vector.load %arg5[%c0_28, %c24] : memref<8x32xbf16, #tpu.memory_space<vmem>>, vector<8x8xbf16>
    tpu.vector_store %arg5[%c0_28, %c24], %87 {strides = array<i32>} : memref<8x32xbf16, #tpu.memory_space<vmem>>, vector<8x8xbf16>,
    %c0_29 = arith.constant 0 : index
    %c0_30 = arith.constant 0 : index
    %89 = vector.load %arg5[%c0_29, %c0_30] : memref<8x32xbf16, #tpu.memory_space<vmem>>, vector<8x32xbf16>
    %c0_31 = arith.constant 0 : index
    %c0_32 = arith.constant 0 : index
    %90 = vector.load %arg3[%c0_31, %c0_32] : memref<32x32xbf16, #tpu.memory_space<vmem>>, vector<32x32xbf16>
    %cst_33 = arith.constant dense<0.000000e+00> : vector<8x32xf32>
    %91 = tpu.matmul %89, %90, %cst_33 {dimension_numbers = #tpu.dot_dimension_numbers<[1], [0], [0], [1], [0, 0, 1, 1], [], []>} : vector<8x32xbf16>, vector<32x32xbf16>, vector<8x32xf32> -> vector<8x32xf32>
    %c0_34 = arith.constant 0 : index
    %c0_35 = arith.constant 0 : index
    %c0_36 = arith.constant 0 : index
    %92 = vector.load %arg4[%c0_34, %c0_35, %c0_36] : memref<1x8x32xf32, #tpu.memory_space<vmem>>, vector<1x8x32xf32>
    %93 = vector.shape_cast %92 : vector<1x8x32xf32> to vector<8x32xf32>
    %94 = vector.shape_cast %91 : vector<8x32xf32> to vector<1x8x32xf32>
    tpu.vector_store %arg4[%c0_34, %c0_35, %c0_36], %94 {strides = array<i32>} : memref<1x8x32xf32, #tpu.memory_space<vmem>>, vector<1x8x32xf32>,
    return
  }
  func.func @transform_0(%arg0: i32) -> (i32, i32, i32) {
    %c0_i32 = arith.constant 0 : i32
    %c0_i32_0 = arith.constant 0 : i32
    %c0_i32_1 = arith.constant 0 : i32
    return %arg0, %c0_i32, %c0_i32_0 : i32, i32, i32
  }
  func.func @transform_1(%arg0: i32) -> (i32, i32) {
    %c0_i32 = arith.constant 0 : i32
    %c0_i32_0 = arith.constant 0 : i32
    %c0_i32_1 = arith.constant 0 : i32
    return %c0_i32, %c0_i32_0 : i32, i32
  }
  func.func @transform_2(%arg0: i32) -> (i32, i32) {
    %c0_i32 = arith.constant 0 : i32
    %c0_i32_0 = arith.constant 0 : i32
    %c0_i32_1 = arith.constant 0 : i32
    return %c0_i32, %c0_i32_0 : i32, i32
  }
  func.func @transform_3(%arg0: i32) -> (i32, i32, i32) {
    %c0_i32 = arith.constant 0 : i32
    %c0_i32_0 = arith.constant 0 : i32
    %c0_i32_1 = arith.constant 0 : i32
    return %arg0, %c0_i32, %c0_i32_0 : i32, i32, i32
  }
}

</mosaic_0001>

<bundles_post_ra>
// kernel: tpu_custom_call.1
= control target key start
LH: loop header
LB: loop body
LE: loop exit
PB: predicated region body
PF: predicated region fallthrough
CT: control target
= control target key end

     0   :  { %8 = vsyncpa [#allocation4], 0  ;;  %s1660_s0 = inlined_call_operand.hbm [shape: f32[2,8,32], index: 0, kind: input, shape index: {}]   ;;  %s1661_s1 = inlined_call_operand.hbm [shape: bf16[32,96], index: 1, kind: input, shape index: {}]   ;;  %s1662_s2 = inlined_call_operand.hbm [shape: bf16[32,32], index: 2, kind: input, shape index: {}]   ;;  %s1663_s3 = inlined_call_operand.hbm [shape: f32[2,8,32], index: 3, kind: output, shape index: {}]  }
   0x1   :  { %10 = vsyncpa [#allocation4 + $0x1], 0 }
   0x2   :  { %11 = vsyncpa [#allocation7], 0 }
   0x3   :  { %12 = vsyncpa [#allocation5], 0 }
   0x4   :  { %14 = vsyncpa [#allocation5 + $0x1], 0  ;;  %s1350_s12 = smov 0   ;;  %s1352_s13 = smov 0  }
   0x5   :  { %s1354_s14 = smov 0   ;;  %s1356_s15 = smov 0  }
   0x6 LB: > { %s1371_s16 = sadd.s32 4294967295, %s1306_s15   ;;  %s923_s17 = sadd.s32 4294967294, %s1306_s15   ;;  %s1306_s15 = sphi %s1356_s15, %s1683_s15   ;;  %s1302_s14 = sphi %s1354_s14, %s1682_s14   ;;  %s1298_s13 = sphi %s1352_s13, %s1681_s13   ;;  %s1294_s12 = sphi %s1350_s12, %s1680_s12  }
   0x7   : > { %p40_p0 = scmp.ne.s32.totalorder %s1298_s13, %s1294_s12  ;;  %p1664_p1 = scmp.eq.s32.totalorder %s1371_s16, 0 }
   0x8   : > { %p112_p3 = scmp.eq.s32.totalorder %s923_s17, 1  ;;  %p924_p5 = scmp.ge.s32.totalorder %s1306_s15, 1 }
   0x9   : > { %p1380_p4 = por %p1664_p1, %p40_p0  ;;  %p119_p7 = scmp.lt.s32.totalorder %s1306_s15, 3 }
   0xa   : > { %p1385_p6 = por %p112_p3, %p40_p0  ;;  %s1308_s21 = smov [#allocation6]  }
   0xb   : > { %s1667_s18 = scalar_select %p1380_p4, 1, 0 }
   0xc   : > { %s1668_s19 = scalar_select %p1385_p6, 1, 0 }
   0xd   : > { %p1390_p8 = pnand %p924_p5, %p119_p7  ;;  %s131_s22 = sshll.u32 %s1308_s21, 4  ;;  %s1394_s22 = int_to_ptr.vmem [resolvable:$true] %s131_s22 }
   0xe   : > { %s1309_s24 = smov [#allocation8]   ;;  %s1150_s28 = scalar_lea.hbm %s1661_s1, 256 }
   0xf   : > { %p1057_p9 = pneg %p1390_p8  ;;  %s144_s25 = sshll.u32 %s1309_s24, 4  ;;  %s1405_s25 = int_to_ptr.vmem [resolvable:$true] %s144_s25 }
  0x10   : > { %p1151_p12 = scmp.ne.s32.totalorder %s1661_s1, %s1150_s28  ;;  %p1157_p5 = scmp.lt.u32.totalorder %s1150_s28, %s1661_s1 }
  0x11   : > { %p1401_p11 = pnand %p1057_p9, %p1664_p1 }
  0x13   : > { %p1152_p13 = pneg %p1401_p11 }
  0x15   : > { %p1153_p0 = pnand %p1152_p13, %p1151_p12 }
  0x17   : > { %p1154_p3 = pneg %p1153_p0 }
  0x19   : > { %p1159_p7 = pnand %p1157_p5, %p1154_p3 }
  0x1b   : > { %1162 = shalt.err (!%p1159_p7)
}
  0x1c   : > { %s1163_s6 = scalar_lea.vmem %s1394_s22, 256  ;;  %p1171_p2 = scmp.lt.s32.totalorder %s1394_s22, %s1394_s22 }
  0x1d   : > { %p1164_p9 = scmp.ne.s32.totalorder %s1394_s22, %s1163_s6  ;;  %p1172_p12 = scmp.lt.s32.totalorder %s1163_s6, %s1163_s6 }
  0x1f   : > { %p1166_p10 = pnand %p1164_p9, %p1152_p13  ;;  %p1173_p0 = por %p1172_p12, %p1171_p2 }
  0x21   : > { %p1167_p1 = pneg %p1166_p10 }
  0x23   : > { %p1174_p6 = pnand %p1173_p0, %p1167_p1 }
  0x25   : > { %1177 = shalt.err (!%p1174_p6)
}
  0x26   : > { %s1310_s7 = smov 64   ;;  %s1311_s8 = smov 4  }
  0x27   : > { %1060 = dma.hbm_to_vmem [thread:$0]  (!%p1401_p11), %s1661_s1, 256, %s1394_s22, [#allocation7], %s1310_s7, %s1310_s7, %s1311_s8  }
  0x28   : > { %s1178_s21 = scalar_lea.hbm %s1662_s2, 256 }
  0x29   : > { %p1179_p2 = scmp.ne.s32.totalorder %s1662_s2, %s1178_s21  ;;  %p1185_p10 = scmp.lt.u32.totalorder %s1178_s21, %s1662_s2 }
  0x2b   : > { %p1181_p1 = pnand %p1179_p2, %p1152_p13 }
  0x2d   : > { %p1182_p6 = pneg %p1181_p1 }
  0x2f   : > { %p1187_p3 = pnand %p1185_p10, %p1182_p6 }
  0x31   : > { %1190 = shalt.err (!%p1187_p3)
}
  0x32   : > { %s1191_s22 = scalar_lea.vmem %s1405_s25, 256  ;;  %p1199_p12 = scmp.lt.s32.totalorder %s1405_s25, %s1405_s25 }
  0x33   : > { %p1192_p5 = scmp.ne.s32.totalorder %s1405_s25, %s1191_s22  ;;  %p1200_p0 = scmp.lt.s32.totalorder %s1191_s22, %s1191_s22 }
  0x35   : > { %p1194_p7 = pnand %p1192_p5, %p1152_p13  ;;  %p1201_p2 = por %p1200_p0, %p1199_p12 }
  0x37   : > { %p1195_p9 = pneg %p1194_p7 }
  0x39   : > { %p1202_p1 = pnand %p1201_p2, %p1195_p9 }
  0x3b   : > { %1205 = shalt.err (!%p1202_p1)
}
  0x3c   : > { %1063 = dma.hbm_to_vmem [thread:$0]  (!%p1401_p11), %s1662_s2, 256, %s1405_s25, [#allocation7], %s1310_s7, %s1310_s7, %s1311_s8  }
  0x3d   : > { %s1460_s4 = sadd.s32 1, %s1306_s15   ;;  %s27_s23 = sadd.s32 1, %s1302_s14 }
  0x3e   : > { %s24_s5 = ssub.s32 %s1306_s15, %s1460_s4  ;;  %p34_p13 = scmp.ne.s32.totalorder %s1302_s14, %s1298_s13 }
  0x3f   : > { %p25_p6 = scmp.eq.s32.totalorder %s24_s5, 0  ;;  %p35_p10 = scmp.eq.s32.totalorder %s1306_s15, 0 }
  0x40   : > { %p1671_p3 = scmp.eq.s32.totalorder %s1371_s16, 1  ;;  %p1074_p7 = scmp.lt.s32.totalorder %s1306_s15, 2 }
  0x41   : > { %s1476_s9 = scalar_select %p25_p6, %s1302_s14, %s27_s23  }
  0x42   : > { %p1470_p5 = por %p1671_p3, %p34_p13  ;;  %p36_p9 = por %p35_p10, %p34_p13 }
  0x43   : > { %s158_s10 = sand.u32 1, %s1302_s14   ;;  %s929_s25 = sshll.u32 %s1306_s15, 7 }
  0x44   : > { %s1672_s6 = scalar_select %p1470_p5, 1, 0 }
  0x45   : > { %s928_s11 = sshll.u32 %s158_s10, 3  ;;  %s1483_s17 = scalar_lea.hbm %s1660_s0, %s929_s25 }
  0x46   : > { %s162_s21 = scalar_lea.vmem [#allocation3], %s928_s11  ;;  %p1487_p11 = pnand %p1074_p7, %p36_p9 }
  0x47   : > { %s169_s24 = sshll.u32 %s162_s21, 4  ;;  %s159_s27 = scalar_lea.sflag [#allocation4], %s158_s10  ;;  %s1485_s24 = int_to_ptr.vmem [resolvable:$true] %s169_s24 }
  0x48   : > { %s1206_s28 = scalar_lea.hbm %s1483_s17, 128  ;;  %p1208_p0 = pneg %p1487_p11 }
  0x49   : > { %p1207_p12 = scmp.ne.s32.totalorder %s1483_s17, %s1206_s28  ;;  %s1211_s30 = scalar_lea.hbm %s1660_s0, 256 }
  0x4a   : > { %p1212_p13 = scmp.lt.u32.totalorder %s1483_s17, %s1660_s0  ;;  %p1213_p6 = scmp.lt.u32.totalorder %s1211_s30, %s1206_s28 }
  0x4b   : > { %p1209_p2 = pnand %p1208_p0, %p1207_p12  ;;  %p1215_p3 = scmp.lt.u32.totalorder %s1206_s28, %s1483_s17 }
  0x4c   : > { %p1214_p10 = por %p1213_p6, %p1212_p13 }
  0x4d   : > { %p1210_p1 = pneg %p1209_p2 }
  0x4e   : > { %p1216_p7 = por %p1215_p3, %p1214_p10 }
  0x50   : > { %p1217_p9 = pnand %p1216_p7, %p1210_p1 }
  0x52   : > { %1220 = shalt.err (!%p1217_p9)
}
  0x53   : > { %s1221_s10 = scalar_lea.vmem %s1485_s24, 128  ;;  %s1312_s11 = smov [#allocation3]  }
  0x54   : > { %p1222_p12 = scmp.ne.s32.totalorder %s1485_s24, %s1221_s10  ;;  %s1226_s25 = sshll.u32 %s1312_s11, 4  ;;  %s1227_s25 = int_to_ptr.vmem [resolvable:$false] %s1226_s25 }
  0x55   : > { %s1228_s7 = scalar_lea.vmem %s1227_s25, 256  ;;  %p1229_p4 = scmp.lt.s32.totalorder %s1485_s24, %s1227_s25 }
  0x56   : > { %p1224_p2 = pnand %p1222_p12, %p1208_p0  ;;  %p1230_p13 = scmp.lt.s32.totalorder %s1228_s7, %s1221_s10 }
  0x58   : > { %p1225_p5 = pneg %p1224_p2  ;;  %p1231_p6 = por %p1230_p13, %p1229_p4 }
  0x5a   : > { %p1232_p10 = pnand %p1231_p6, %p1225_p5 }
  0x5c   : > { %1235 = shalt.err (!%p1232_p10)
}
  0x5d   : > { %1067 = dma.hbm_to_vmem [thread:$0]  (!%p1487_p11), %s1483_s17, 128, %s1485_s24, %s159_s27  }
  0x5e   : > { %178 = sbr.rel (%p1390_p8) target bundleno = 1607 (0x647), region = 32  ;;  %s1519_s8 = sand.u32 (!%p1390_p8), 1, %s1298_s13  }
  0x5f   : > { %s931_s21 = sshll.u32 (!%p1390_p8), %s1519_s8, 3  ;;  %s181_s28 = scalar_lea.sflag (!%p1390_p8), [#allocation4], %s1519_s8 }
  0x60   : > { %s184_s22 = scalar_lea.vmem (!%p1390_p8), [#allocation3], %s931_s21  ;;  %p1674_p4 = scmp.ne.s32.totalorder (!%p1390_p8), %s1667_s18, 0 }
  0x65   : > { %1281 = dma.done.wait (%p1674_p4), %s181_s28, 128  }
  0x66   : > { %1283 = vsyncadd (%p1674_p4), %s181_s28, 4294967168  ;;  %p1675_p5 = scmp.eq.s32.totalorder %s1371_s16, 0 }
  0x68   : > { %1285 = dma.done.wait (%p1675_p5), [#allocation7], 512   ;;  %p1676_p8 = pmov %p1675_p5 }
  0x69   : > { %v1313_v0 = vmov 0.0   ;;  %vm1314_vm0 = vmmov 0   ;;  %v1130_v1 = vld [vmem:[#allocation6] sm:$0xff]   ;;  %v1131_v2 = vld [vmem:[#allocation6 + $0x8] sm:$0xff]   ;;  %v216_v3 = vld [vmem:[%s184_s22] sm:$0xff]  ;;  %vm234_vm1 = vcmask 261120   ;;  %v279_v21 = vlaneseq }
  0x6a   : > { %1287 = vsyncadd (%p1676_p8), [#allocation7], 4294966784  ;;  %981 = vmatprep.subr.bf16.mxu0 %v1313_v0  ;;  %985 = vmatprep.mubr.msk.bf16.mxu0 %vm1314_vm0, %v1313_v0  ;;  %v217_v4 = vpack.c.bf16 %v216_v3, %v216_v3  ;;  %s1315_s18 = smov 120   ;;  %s1316_s20 = smov 96   ;;  %vm287_vm2 = vcmask 64512   ;;  %vm352_vm4 = vcmask 1043456  }
  0x6b   : > { %989 = vmatprep.subr.bf16.mxu1 %v1313_v0  ;;  %991 = vmatprep.mubr.msk.bf16.mxu1 %vm1314_vm0, %v1313_v0  ;;  %s1317_s17 = smov 80   ;;  %s1318_s24 = smov 88   ;;  %v280_v22 = vshrl.u32 %v279_v21, 7  ;;  %v282_v23 = vand.u32 127, %v279_v21  ;;  %vm397_vm5 = vcmask 60416   ;;  %vm517_vm6 = vcmask 126016  }
  0x6c   : > { %982 = vmatpush3.bf16.msra.mxu0 %v1130_v1  ;;  %s1319_s26 = smov 72   ;;  %s1320_s27 = smov 112   ;;  %vm637_vm7 = vcmask 191616   ;;  %vm757_vm8 = vcmask 257216  }
  0x6d   : > { %983 = vmatprep.subr.bf16.mxu0 %v1313_v0  ;;  %s1321_s29 = smov 104   ;;  %vm283_vm3 = vcmp.le.s32.totalorder %v282_v23, %v280_v22  ;;  %s1322_s30 = smov 56  }
  0x6e   : > { %s1323_s23 = smov 64   ;;  %s1324_s5 = smov 40  }
  0x6f   : > { %s1325_s10 = smov 48   ;;  %s1326_s11 = smov 8  }
  0x70   : > { %984 = vmatpush3.bf16.msra.mxu0 %v1131_v2  ;;  %s1327_s25 = smov 16   ;;  %s1328_s7 = smov 24  }
  0x71   : > { %995 = vmatprep.subr.bf16.mxu0 %v1313_v0  ;;  %s953_s28 = sshll.u32 %s1371_s16, 7  ;;  %s214_s22 = scalar_lea.vmem [#allocation9], %s931_s21 }
  0x72   : > { %p1677_p0 = scmp.ne.s32.totalorder %s1672_s6, 0  ;;  %s1329_s21 = smov [#allocation9]  }
  0x73   : > { %986 = vmatmul.mubr.msk.bf16.vlgmr.msra.gmra.mrb[0].mxu0 %vm234_vm1, %v217_v4 }
  0x74   : > { %997 = vmatprep.mubr.msk.bf16.mxu0 %vm1314_vm0, %v1313_v0 }
 0x146   : > { %v272_v5 = vpop.f32.mrb[0].mxu0 }
 0x147   : > { %v1544_v6 = vpack.c.bf16 %v272_v5, %v272_v5  ;;  %v987_v7 = vpop.f32.mrb[1].mxu0 }
 0x148   : > { %v275_v8 = vpop.f32.mrb[2].mxu0 }
 0x149   : > { %399 = vrot.lane.b32.xlu1 %v1544_v6, %s1315_s18  ;;  %285 = vrot.lane.b32.xlu0 %v1544_v6, %s1316_s20  ;;  %v988_v9 = vpop.f32.mrb[3].mxu0  ;;  %s834_s18 = sshll.u32 %s214_s22, 4  ;;  %s1617_s18 = int_to_ptr.vmem [resolvable:$true] %s834_s18 }
 0x14a   : > { %s1236_s16 = scalar_lea.vmem %s1617_s18, 128 }
 0x14b   : > { %p1237_p11 = scmp.ne.s32.totalorder %s1617_s18, %s1236_s16 }
 0x14d   : > { %521 = vrot.lane.b32.xlu1 %v1544_v6, %s1317_s17  ;;  %401 = vrot.lane.b32.xlu0 %v1544_v6, %s1318_s24  ;;  %s1615_s24 = scalar_lea.hbm %s1663_s3, %s953_s28  ;;  %p1238_p1 = pnand %p1237_p11, %p1677_p0 }
 0x14f   : > { %p1239_p3 = pneg %p1238_p1 }
 0x151   : > { %641 = vrot.lane.b32.xlu1 %v1544_v6, %s1319_s26  ;;  %519 = vrot.lane.b32.xlu0 %v1544_v6, %s1320_s27  ;;  %s821_s26 = scalar_lea.sflag [#allocation5], %s1519_s8  ;;  %s1240_s27 = sshll.u32 %s1329_s21, 4  ;;  %s1241_s27 = int_to_ptr.vmem [resolvable:$false] %s1240_s27 }
 0x152   : > { %p1243_p7 = scmp.lt.s32.totalorder %s1617_s18, %s1241_s27 }
 0x155   : > { %639 = vrot.lane.b32.xlu0 %v1544_v6, %s1321_s29  ;;  %s1242_s29 = scalar_lea.vmem %s1241_s27, 256 }
 0x156   : > { %p1244_p9 = scmp.lt.s32.totalorder %s1242_s29, %s1236_s16 }
 0x158   : > { %p1245_p12 = por %p1244_p9, %p1243_p7 }
 0x15a   : > { %p1246_p2 = pnand %p1245_p12, %p1239_p3 }
 0x1bb   : > { %v286_v10 = vpop.permute.xlu0 %285  ;;  %v400_v13 = vpop.permute.xlu1 %399 }
 0x1bc   : > { %v292_v11 = vsel %vm287_vm2, %v286_v10, 0 }
 0x1bd   : > { %990 = vmatpush3.bf16.xpose.msra.mxu1 %v292_v11 }
 0x1be   : > { %1001 = vmatprep.subr.bf16.mxu1 %v1313_v0 }
 0x1bf   : > { %v402_v12 = vpop.permute.xlu0 %401  ;;  %v522_v15 = vpop.permute.xlu1 %521 }
 0x1c0   : > { %v407_v14 = vsel %vm287_vm2, %v402_v12, 0  ;;  %v527_v16 = vsel %vm287_vm2, %v522_v15, 0 }
 0x1c3   : > { %v642_v17 = vpop.permute.xlu1 %641  ;;  %v520_v18 = vpop.permute.xlu0 %519 }
 0x1c4   : > { %992 = vmatmul.mubr.msk.bf16.vlgmr.msra.gmra.mrb[0].mxu1 %vm287_vm2, %v1544_v6  ;;  %v647_v19 = vsel %vm287_vm2, %v642_v17, 0 }
 0x1c5   : > { %1002 = vmatpush3.bf16.xpose.msra.mxu1 %v407_v14  ;;  %1003 = vmatprep.mubr.msk.bf16.mxu1 %vm1314_vm0, %v1313_v0 }
 0x1c6   : > { %1013 = vmatprep.subr.bf16.mxu1 %v1313_v0 }
 0x1c7   : > { %v640_v20 = vpop.permute.xlu0 %639 }
 0x1cc   : > { %1004 = vmatmul.mubr.msk.bf16.vlgmr.msra.gmra.mrb[4].mxu1 %vm287_vm2, %v400_v13 }
 0x1cd   : > { %1014 = vmatpush3.bf16.xpose.msra.mxu1 %v527_v16  ;;  %1015 = vmatprep.mubr.msk.bf16.mxu1 %vm1314_vm0, %v1313_v0 }
 0x1ce   : > { %1025 = vmatprep.subr.bf16.mxu1 %v1313_v0 }
 0x1d4   : > { %1016 = vmatmul.mubr.msk.bf16.vlgmr.msra.gmra.mrb[8].mxu1 %vm287_vm2, %v520_v18 }
 0x1d5   : > { %1026 = vmatpush3.bf16.xpose.msra.mxu1 %v647_v19  ;;  %1027 = vmatprep.mubr.msk.bf16.mxu1 %vm1314_vm0, %v1313_v0 }
 0x1d6   : > { %1037 = vmatprep.subr.bf16.mxu1 %v1313_v0 }
 0x1dc   : > { %1028 = vmatmul.mubr.msk.bf16.vlgmr.msra.gmra.mrb[12].mxu1 %vm287_vm2, %v640_v20 }
 0x1dd   : > { %1041 = vmatprep.mubr.msk.bf16.mxu1 %vm1314_vm0, %v1313_v0 }
 0x297   : > { %v328_v24 = vpop.f32.mrb[0].mxu1 }
 0x298   : > { %v334_v25 = vsel %vm283_vm3, %v328_v24, -inf  ;;  %v993_v26 = vpop.f32.mrb[1].mxu1 }
 0x299   : > { %v331_v27 = vpop.f32.mrb[2].mxu1  ;;  %v335_v28 = vsel %vm287_vm2, %v334_v25, -inf }
 0x29a   : > { %336 = vmax.xlane.f32.xlu1 %v335_v28  ;;  %v994_v29 = vpop.f32.mrb[3].mxu1 }
 0x29f   : > { %v443_v30 = vpop.f32.mrb[4].mxu1 }
 0x2a0   : > { %v449_v31 = vsel %vm283_vm3, %v443_v30, -inf  ;;  %v1005_v32 = vpop.f32.mrb[5].mxu1 }
 0x2a1   : > { %v446_v33 = vpop.f32.mrb[6].mxu1  ;;  %v450_v34 = vsel %vm287_vm2, %v449_v31, -inf }
 0x2a2   : > { %451 = vmax.xlane.f32.xlu0 %v450_v34  ;;  %v1006_v35 = vpop.f32.mrb[7].mxu1 }
 0x2a7   : > { %v563_v36 = vpop.f32.mrb[8].mxu1 }
 0x2a8   : > { %v569_v37 = vsel %vm283_vm3, %v563_v36, -inf  ;;  %v1017_v38 = vpop.f32.mrb[9].mxu1 }
 0x2a9   : > { %v566_v39 = vpop.f32.mrb[10].mxu1  ;;  %v570_v40 = vsel %vm287_vm2, %v569_v37, -inf }
 0x2aa   : > { %571 = vmax.xlane.f32.xlu0 %v570_v40  ;;  %v1018_v41 = vpop.f32.mrb[11].mxu1  ;;  %v1132_v39 = vld [vmem:[#allocation8] sm:$0xff]   ;;  %v1133_v40 = vld [vmem:[#allocation8 + $0x8] sm:$0xff]  }
 0x2ab   : > { %1038 = vmatpush3.bf16.msra.mxu1 %v1132_v39 }
 0x2ac   : > { %1039 = vmatprep.subr.bf16.mxu1 %v1313_v0 }
 0x2af   : > { %v683_v42 = vpop.f32.mrb[12].mxu1  ;;  %1040 = vmatpush3.bf16.msra.mxu1 %v1133_v40 }
 0x2b0   : > { %v689_v43 = vsel %vm283_vm3, %v683_v42, -inf  ;;  %v1029_v44 = vpop.f32.mrb[13].mxu1 }
 0x2b1   : > { %v686_v45 = vpop.f32.mrb[14].mxu1  ;;  %v690_v46 = vsel %vm287_vm2, %v689_v43, -inf }
 0x2b2   : > { %691 = vmax.xlane.f32.xlu1 %v690_v46  ;;  %v1030_v47 = vpop.f32.mrb[15].mxu1 }
 0x327   : > { %v337_v48 = vpop.xlane.xlu1 %336 }
 0x328   : > { %v338_v49 = vsub.f32 %v334_v25, %v337_v48 }
 0x32a   : > { %v339_v50 = vmul.f32 1.442695, %v338_v49 }
 0x32c   : > { %1134 = vpow2.f32 %v339_v50 }
 0x32f   : > { %v452_v51 = vpop.xlane.xlu0 %451 }
 0x330   : > { %v453_v52 = vsub.f32 %v449_v31, %v452_v51 }
 0x332   : > { %v454_v53 = vmul.f32 1.442695, %v453_v52 }
 0x334   : > { %1136 = vpow2.f32 %v454_v53 }
 0x336   : > { %v1135_v54 = vpop.eup %1134 }
 0x337   : > { %v572_v55 = vpop.xlane.xlu0 %571  ;;  %v341_v56 = vsel %vm287_vm2, %v1135_v54, 0.0 }
 0x338   : > { %v573_v57 = vsub.f32 %v569_v37, %v572_v55  ;;  %342 = vadd.xlane.f32.xlu0 %v341_v56 }
 0x33a   : > { %v574_v58 = vmul.f32 1.442695, %v573_v57 }
 0x33c   : > { %1138 = vpow2.f32 %v574_v58 }
 0x33e   : > { %v1137_v59 = vpop.eup %1136 }
 0x33f   : > { %v456_v60 = vsel %vm287_vm2, %v1137_v59, 0.0  ;;  %v692_v63 = vpop.xlane.xlu1 %691 }
 0x340   : > { %457 = vadd.xlane.f32.xlu1 %v456_v60  ;;  %v693_v1 = vsub.f32 %v689_v43, %v692_v63 }
 0x342   : > { %v694_v2 = vmul.f32 1.442695, %v693_v1 }
 0x344   : > { %1140 = vpow2.f32 %v694_v2 }
 0x346   : > { %v1139_v61 = vpop.eup %1138 }
 0x347   : > { %v576_v62 = vsel %vm287_vm2, %v1139_v61, 0.0 }
 0x348   : > { %577 = vadd.xlane.f32.xlu0 %v576_v62 }
 0x34e   : > { %v1141_v3 = vpop.eup %1140 }
 0x34f   : > { %v696_v4 = vsel %vm287_vm2, %v1141_v3, 0.0 }
 0x351   : > { %462 = vrot.lane.b32.xlu1 %v1544_v6, %s1322_s30 }
 0x35e   : > { %347 = vrot.lane.b32.xlu0 %v1544_v6, %s1323_s23 }
 0x362   : > { %702 = vrot.lane.b32.xlu0 %v1544_v6, %s1324_s5 }
 0x375   : > { %697 = vadd.xlane.f32.xlu1 %v696_v4 }
 0x386   : > { %582 = vrot.lane.b32.xlu1 %v1544_v6, %s1325_s10 }
 0x3c5   : > { %v343_v5 = vpop.xlane.xlu0 %342 }
 0x3c6   : > { %1142 = vrcp.f32 %v343_v5 }
 0x3cd   : > { %v458_v7 = vpop.xlane.xlu1 %457 }
 0x3ce   : > { %1144 = vrcp.f32 %v458_v7 }
 0x3d0   : > { %v1143_v8 = vpop.eup %1142 }
 0x3d1   : > { %v345_v10 = vmul.f32 %v1143_v8, %v1135_v54  ;;  %v463_v13 = vpop.permute.xlu1 %462 }
 0x3d2   : > { %v468_v16 = vsel %vm352_vm4, %v463_v13, 0 }
 0x3d3   : > { %v346_v14 = vpack.c.bf16 %v345_v10, %v345_v10 }
 0x3d5   : > { %v578_v9 = vpop.xlane.xlu0 %577 }
 0x3d6   : > { %1146 = vrcp.f32 %v578_v9 }
 0x3d8   : > { %v1145_v15 = vpop.eup %1144 }
 0x3d9   : > { %v348_v11 = vpop.permute.xlu0 %347  ;;  %v460_v6 = vmul.f32 %v1145_v15, %v1137_v59 }
 0x3da   : > { %v354_v12 = vsel %vm352_vm4, %v348_v11, 0 }
 0x3db   : > { %996 = vmatpush3.bf16.msra.mxu0 %v354_v12  ;;  %v461_v17 = vpack.c.bf16 %v460_v6, %v460_v6 }
 0x3dc   : > { %1007 = vmatprep.subr.bf16.mxu0 %v1313_v0 }
 0x3dd   : > { %v703_v23 = vpop.permute.xlu0 %702 }
 0x3de   : > { %998 = vmatmul.mubr.msk.bf16.vlgmr.msra.gmra.mrb[4].mxu0 %vm287_vm2, %v346_v14  ;;  %v708_v25 = vsel %vm352_vm4, %v703_v23, 0 }
 0x3df   : > { %1008 = vmatpush3.bf16.msra.mxu0 %v468_v16  ;;  %1009 = vmatprep.mubr.msk.bf16.mxu0 %vm1314_vm0, %v1313_v0 }
 0x3e0   : > { %1019 = vmatprep.subr.bf16.mxu0 %v1313_v0  ;;  %v1147_v18 = vpop.eup %1146 }
 0x3e1   : > { %v580_v20 = vmul.f32 %v1147_v18, %v1139_v61 }
 0x3e3   : > { %v581_v24 = vpack.c.bf16 %v580_v20, %v580_v20 }
 0x3e6   : > { %1010 = vmatmul.mubr.msk.bf16.vlgmr.msra.gmra.mrb[8].mxu0 %vm287_vm2, %v461_v17 }
 0x3e7   : > { %1021 = vmatprep.mubr.msk.bf16.mxu0 %vm1314_vm0, %v1313_v0 }
 0x402   : > { %v698_v19 = vpop.xlane.xlu1 %697 }
 0x403   : > { %1148 = vrcp.f32 %v698_v19 }
 0x406   : > { %v583_v21 = vpop.permute.xlu1 %582 }
 0x407   : > { %v588_v22 = vsel %vm352_vm4, %v583_v21, 0 }
 0x408   : > { %1020 = vmatpush3.bf16.msra.mxu0 %v588_v22 }
 0x409   : > { %1031 = vmatprep.subr.bf16.mxu0 %v1313_v0 }
 0x40b   : > { %1022 = vmatmul.mubr.msk.bf16.vlgmr.msra.gmra.mrb[12].mxu0 %vm287_vm2, %v581_v24 }
 0x40c   : > { %1032 = vmatpush3.bf16.msra.mxu0 %v708_v25  ;;  %1033 = vmatprep.mubr.msk.bf16.mxu0 %vm1314_vm0, %v1313_v0 }
 0x40d   : > { %v1149_v26 = vpop.eup %1148 }
 0x40e   : > { %v700_v27 = vmul.f32 %v1149_v26, %v1141_v3 }
 0x410   : > { %v701_v28 = vpack.c.bf16 %v700_v27, %v700_v27 }
 0x413   : > { %1034 = vmatmul.mubr.msk.bf16.vlgmr.msra.gmra.mrb[16].mxu0 %vm287_vm2, %v701_v28 }
 0x4b1   : > { %v390_v29 = vpop.f32.mrb[4].mxu0 }
 0x4b2   : > { %v396_v30 = vpack.c.bf16 %v390_v29, %v390_v29  ;;  %v999_v31 = vpop.f32.mrb[5].mxu0 }
 0x4b3   : > { %v393_v32 = vpop.f32.mrb[6].mxu0 }
 0x4b4   : > { %398 = vst.msk [vmem:[#allocation2] sm:$0xf] %vm397_vm5, %v396_v30  ;;  %v1000_v33 = vpop.f32.mrb[7].mxu0 }
 0x4b9   : > { %v504_v34 = vpop.f32.mrb[8].mxu0 }
 0x4ba   : > { %v956_v35 = vpack.c.bf16 %v504_v34, %v504_v34  ;;  %v1011_v36 = vpop.f32.mrb[9].mxu0 }
 0x4bb   : > { %v507_v37 = vpop.f32.mrb[10].mxu0 }
 0x4bc   : > { %514 = vrot.lane.b32.xlu1 %v956_v35, %s1326_s11  ;;  %v1012_v38 = vpop.f32.mrb[11].mxu0 }
 0x4de   : > { %v624_v41 = vpop.f32.mrb[12].mxu0 }
 0x4df   : > { %v957_v42 = vpack.c.bf16 %v624_v41, %v624_v41  ;;  %v1023_v43 = vpop.f32.mrb[13].mxu0 }
 0x4e0   : > { %v627_v44 = vpop.f32.mrb[14].mxu0 }
 0x4e1   : > { %634 = vrot.lane.b32.xlu0 %v957_v42, %s1327_s25  ;;  %v1024_v45 = vpop.f32.mrb[15].mxu0 }
 0x4e6   : > { %v744_v46 = vpop.f32.mrb[16].mxu0 }
 0x4e7   : > { %v958_v47 = vpack.c.bf16 %v744_v46, %v744_v46  ;;  %v1035_v48 = vpop.f32.mrb[17].mxu0 }
 0x4e8   : > { %v747_v49 = vpop.f32.mrb[18].mxu0 }
 0x4e9   : > { %754 = vrot.lane.b32.xlu1 %v958_v47, %s1328_s7  ;;  %v1036_v50 = vpop.f32.mrb[19].mxu0 }
 0x52e   : > { %v515_v51 = vpop.permute.xlu1 %514 }
 0x52f   : > { %518 = vst.msk [vmem:[#allocation2] sm:$0xf] %vm517_vm6, %v515_v51 }
 0x553   : > { %v635_v0 = vpop.permute.xlu0 %634 }
 0x554   : > { %638 = vst.msk [vmem:[#allocation2] sm:$0xf] %vm637_vm7, %v635_v0 }
 0x55b   : > { %v755_v52 = vpop.permute.xlu1 %754 }
 0x55c   : > { %758 = vst.msk [vmem:[#allocation2] sm:$0xf] %vm757_vm8, %v755_v52 }
 0x563   : > { %v759_v53 = vld [vmem:[#allocation2] sm:$0xf] }
 0x564   : > { %1042 = vmatmul.mubr.msk.bf16.vlgmr.msra.gmra.mrb[16].mxu1 %vm234_vm1, %v759_v53 }
 0x637   : > { %v813_v54 = vpop.f32.mrb[16].mxu1 }
 0x638   : > { %819 = vst.msk [vmem:[%s214_s22] sm:$0xff] %vm234_vm1, %v813_v54  ;;  %v1043_v55 = vpop.f32.mrb[17].mxu1 }
 0x639   : > { %v816_v56 = vpop.f32.mrb[18].mxu1 }
 0x63a   : > { %1249 = shalt.err (!%p1246_p2)
}
 0x63b   : > { %s1250_s8 = scalar_lea.hbm %s1615_s24, 128  ;;  %s1254_s5 = scalar_lea.hbm %s1663_s3, 256 }
 0x63c   : > { %p1251_p13 = scmp.ne.s32.totalorder %s1615_s24, %s1250_s8  ;;  %p1255_p4 = scmp.lt.u32.totalorder %s1615_s24, %s1663_s3 }
 0x63d   : > { %p1256_p5 = scmp.lt.u32.totalorder %s1254_s5, %s1250_s8  ;;  %p1258_p11 = scmp.lt.u32.totalorder %s1250_s8, %s1615_s24 }
 0x63e   : > { %p1252_p6 = pnand %p1251_p13, %p1677_p0 }
 0x63f   : > { %p1257_p8 = por %p1256_p5, %p1255_p4 }
 0x640   : > { %p1253_p10 = pneg %p1252_p6 }
 0x641   : > { %p1259_p1 = por %p1258_p11, %p1257_p8 }
 0x643   : > { %p1260_p3 = pnand %p1259_p1, %p1253_p10 }
 0x645   : > { %1263 = shalt.err (!%p1260_p3)
}
 0x646   : > { %1055 = dma.vmem_to_hbm [thread:$0]  (%p1677_p0), %s1617_s18, 128, %s1615_s24, %s821_s26   ;;  %v1044_v57 = vpop.f32.mrb[19].mxu1 }
 0x647 PF: > { %s846_s25 = sand.u32 1, %s1294_s12   ;;  %p1678_p7 = scmp.ne.s32.totalorder %s1668_s19, 0 }
 0x648   : > { %p1679_p9 = scmp.ge.s32.totalorder %s1306_s15, 2  ;;  %s847_s7 = scalar_lea.sflag [#allocation5], %s846_s25 }
 0x64a   : > { %p1069_p12 = pnand %p1679_p9, %p1678_p7 }
 0x64c   : > { %1289 = dma.done.wait (!%p1069_p12), %s847_s7, 128  }
 0x64d   : > { %1291 = vsyncadd (!%p1069_p12), %s847_s7, 4294967168  ;;  %p17_p2 = scmp.ge.s32.totalorder %s1460_s4, 4   ;;  %s1680_s12 = smov %s1298_s13 }
 0x64e   : > { %s1681_s13 = smov %s1302_s14  ;;  %s1682_s14 = smov %s1476_s9 }
 0x64f   : > { %s1683_s15 = smov %s1460_s4  ;;  %19 = sbr.rel (!%p17_p2) target bundleno = 6 (0x6), region = 85 }
 0x656   :  { %852 = vsyncpa [#allocation4], 1 }
 0x657   :  { %854 = vsyncpa [#allocation4 + $0x1], 1 }
 0x658   :  { %855 = vsyncpa [#allocation7], 1 }
 0x659   :  { %856 = vsyncpa [#allocation5], 1 }
 0x65a   :  { %858 = vsyncpa [#allocation5 + $0x1], 1 }

</bundles_post_ra>
